<compile_context>
chip_gen: v6e
topology: v6e:2x2x1
jax: 0.10.0
libtpu: 0.0.40
codegen_flags: <defaults>
</compile_context>

<pallas_src>
import functools

import jax
import jax.numpy as jnp
from jax.experimental import pallas as pl
from jax.experimental.pallas import tpu as pltpu


def _round_up(x, m):
    return ((x + m - 1) // m) * m


def _pick_tile(n_pad, preferred):
    """Largest lane-aligned tile that divides the padded node count."""
    for t in (preferred, 512, 256, 128):
        if t <= n_pad and n_pad % t == 0:
            return t
    return n_pad


# ---------------------------------------------------------------------------
# Kernel: one GCN layer, grid = (node row tiles, node contraction tiles).
#   adj_ref : [tile_n, tile_k]  bf16  normalized-adjacency tile       (pipelined)
#   x_ref   : [tile_k, d_in]    bf16  node-feature tile               (pipelined)
#   w_ref   : [d_in, d_out]     bf16  pre-transposed weight           (resident)
#   b_ref   : [1, d_out]        f32   bias row                        (resident)
#   o_ref   : [tile_n, d_out]         lane-dense output tile
#   acc_ref : [tile_n, d_in]    f32   VMEM accumulator for A_hat @ X
# ---------------------------------------------------------------------------
def _gcn_layer_kernel(adj_ref, x_ref, w_ref, b_ref, o_ref, acc_ref, *, apply_relu):
    k = pl.program_id(1)

    @pl.when(k == 0)
    def _():
        acc_ref[...] = jnp.zeros_like(acc_ref)

    # aggregate: bf16 x bf16 MXU matmul, f32 accumulation across k tiles.
    acc_ref[...] += jnp.dot(adj_ref[...], x_ref[...],
                            preferred_element_type=jnp.float32)

    @pl.when(k == pl.num_programs(1) - 1)
    def _():
        # transform: cast the small agg tile to bf16 so the second matmul is
        # bf16-native too (no per-step f32 upcast of the whole weight).
        agg = acc_ref[...].astype(jnp.bfloat16)
        z = jnp.dot(agg, w_ref[...], preferred_element_type=jnp.float32) + b_ref[...]
        if apply_relu:
            z = jnp.maximum(z, 0.0)
        o_ref[...] = z.astype(o_ref.dtype)


def _gcn_layer(adj, x, w, b, *, apply_relu, out_dtype, tile_n, tile_k):
    n_pad = adj.shape[0]
    d_in = x.shape[1]
    d_out = w.shape[1]
    assert adj.shape == (n_pad, n_pad) and x.shape[0] == n_pad
    assert n_pad % tile_n == 0 and n_pad % tile_k == 0

    out_bytes = jnp.dtype(out_dtype).itemsize
    flops = 2 * n_pad * n_pad * d_in + 2 * n_pad * d_in * d_out
    bytes_accessed = (adj.size * adj.dtype.itemsize + x.size * x.dtype.itemsize
                      + w.size * w.dtype.itemsize + b.size * b.dtype.itemsize
                      + n_pad * d_out * out_bytes)

    # VMEM footprint: double-buffered adj/x tiles, resident (but still
    # double-buffered-by-default) W/b, output tile, f32 accumulator scratch.
    vmem_bytes = (2 * tile_n * tile_k * 2            # adj tiles (bf16)
                  + 2 * tile_k * d_in * 2            # x tiles (bf16)
                  + 2 * d_in * d_out * 2             # weights (bf16)
                  + 2 * d_out * 4                    # bias (f32)
                  + 2 * tile_n * d_out * out_bytes   # output tiles
                  + tile_n * d_in * 4)               # acc scratch (f32)
    vmem_limit = min(64 << 20, max(32 << 20, int(vmem_bytes * 2)))

    kernel = functools.partial(_gcn_layer_kernel, apply_relu=apply_relu)
    return pl.pallas_call(
        kernel,
        out_shape=jax.ShapeDtypeStruct((n_pad, d_out), out_dtype),
        grid=(n_pad // tile_n, n_pad // tile_k),
        in_specs=[
            pl.BlockSpec((tile_n, tile_k), lambda i, k: (i, k)),  # adjacency tile
            pl.BlockSpec((tile_k, d_in), lambda i, k: (k, 0)),    # feature tile
            pl.BlockSpec((d_in, d_out), lambda i, k: (0, 0)),     # weights (resident)
            pl.BlockSpec((1, d_out), lambda i, k: (0, 0)),        # bias (resident)
        ],
        out_specs=pl.BlockSpec((tile_n, d_out), lambda i, k: (i, 0)),
        scratch_shapes=[pltpu.VMEM((tile_n, d_in), jnp.float32)],
        compiler_params=pltpu.CompilerParams(
            dimension_semantics=("parallel", "arbitrary"),   # megacore shards row tiles
            vmem_limit_bytes=vmem_limit),
        cost_estimate=pl.CostEstimate(
            flops=flops, transcendentals=0, bytes_accessed=bytes_accessed),
    )(adj, x, w, b)


# ---------------------------------------------------------------------------
# Plain-JAX glue
# ---------------------------------------------------------------------------
def normalized_adjacency(edge_index, num_nodes):
    """A_hat = D^-1/2 (A + remaining self loops) D^-1/2, matching PyG gcn_norm
    (add_remaining_self_loops: a self-loop is only added where none exists)."""
    src = edge_index[0]
    dst = edge_index[1]
    a = jnp.zeros((num_nodes, num_nodes), jnp.float32)
    a = a.at[dst, src].add(1.0)                       # row = target, col = source
    idx = jnp.arange(num_nodes)
    diag = a[idx, idx]
    a = a.at[idx, idx].set(jnp.where(diag > 0, diag, 1.0))
    deg = jnp.sum(a, axis=1)
    dinv = jnp.where(deg > 0, 1.0 / jnp.sqrt(deg), 0.0)
    return dinv[:, None] * a * dinv[None, :]


def prepare_graph(edge_index, num_nodes):
    """One-time per graph: dense normalized adjacency, node-padded, bf16."""
    adj = normalized_adjacency(edge_index, num_nodes)
    n_pad = _round_up(num_nodes, 128)
    adj_p = jnp.zeros((n_pad, n_pad), jnp.float32).at[:num_nodes, :num_nodes].set(adj)
    return adj_p.astype(jnp.bfloat16)


def init_params(input_dim, hidden_dim, output_dim, num_classes, key):
    """Weights stored pre-transposed as [in, out] (no per-call transpose needed)."""
    d_in = input_dim + num_classes
    k1, k2, k3, k4 = jax.random.split(key, 4)

    def glorot(k, fan_in, fan_out):
        bound = jnp.sqrt(6.0 / (fan_in + fan_out))
        return jax.random.uniform(k, (fan_in, fan_out), jnp.float32, -bound, bound)

    return dict(
        w1=glorot(k1, d_in, hidden_dim),
        b1=jax.random.uniform(k2, (hidden_dim,), jnp.float32, -0.1, 0.1),
        w2=glorot(k3, hidden_dim, output_dim),
        b2=jax.random.uniform(k4, (output_dim,), jnp.float32, -0.1, 0.1),
    )


def prepare_params(params):
    """One-time: zero-pad feature dims to lane multiples (128), cast weights to bf16."""
    def pad_w(w):
        i, o = w.shape
        ip, op = _round_up(i, 128), _round_up(o, 128)
        return jnp.zeros((ip, op), jnp.float32).at[:i, :o].set(w).astype(jnp.bfloat16)

    def pad_b(b):
        o = b.shape[0]
        op = _round_up(o, 128)
        return jnp.zeros((1, op), jnp.float32).at[0, :o].set(b)

    return dict(w1=pad_w(params["w1"]), b1=pad_b(params["b1"]),
                w2=pad_w(params["w2"]), b2=pad_b(params["b2"]))


def conditional_gnn_forward(x, adj_p, class_labels, prepared,
                            *, num_classes, output_dim, tile_n=512, tile_k=512):
    n = x.shape[0]
    n_pad = adj_p.shape[0]
    tile_n = _pick_tile(n_pad, tile_n)
    tile_k = _pick_tile(n_pad, tile_k)

    one_hot = jax.nn.one_hot(class_labels, num_classes, dtype=jnp.float32)
    x_cond = jnp.concatenate([x, one_hot], axis=-1)

    d_in_pad = prepared["w1"].shape[0]
    x_p = (jnp.zeros((n_pad, d_in_pad), jnp.float32)
           .at[:n, :x_cond.shape[1]].set(x_cond)
           .astype(jnp.bfloat16))

    # Layer 1: bf16 output (halves h1 writeback and hands layer 2 a bf16 operand).
    h1 = _gcn_layer(adj_p, x_p, prepared["w1"], prepared["b1"],
                    apply_relu=True, out_dtype=jnp.bfloat16,
                    tile_n=tile_n, tile_k=tile_k)
    # Layer 2: final output in f32.
    out = _gcn_layer(adj_p, h1, prepared["w2"], prepared["b2"],
                     apply_relu=False, out_dtype=jnp.float32,
                     tile_n=tile_n, tile_k=tile_k)
    return out[:n, :output_dim]


if __name__ == "__main__":
    num_nodes = 8
    input_dim = 16
    hidden_dim = 32
    output_dim = 8
    num_classes = 4

    key = jax.random.PRNGKey(0)
    kx, kl, kp = jax.random.split(key, 3)
    x = jax.random.normal(kx, (num_nodes, input_dim), jnp.float32)
    class_labels = jax.random.randint(kl, (num_nodes,), 0, num_classes, jnp.int32)
    # deterministic undirected ring graph
    src = jnp.arange(num_nodes, dtype=jnp.int32)
    dst = (src + 1) % num_nodes
    edge_index = jnp.stack([jnp.concatenate([src, dst]),
                            jnp.concatenate([dst, src])], axis=0)

    params = init_params(input_dim, hidden_dim, output_dim, num_classes, kp)
    prepared = prepare_params(params)
    adj_p = prepare_graph(edge_index, num_nodes)   # built once per (static) graph

    @jax.jit
    def fwd(x, adj_p, class_labels, prepared):
        return conditional_gnn_forward(x, adj_p, class_labels, prepared,
                                       num_classes=num_classes, output_dim=output_dim)

    out = jax.block_until_ready(fwd(x, adj_p, class_labels, prepared))

    # pure-JAX reference mirroring the kernel's bf16 rounding points
    def ref_forward(x, edge_index, labels, p):
        hi = jax.lax.Precision.HIGHEST
        bf = lambda a: a.astype(jnp.bfloat16).astype(jnp.float32)
        a = bf(normalized_adjacency(edge_index, x.shape[0]))
        xin = bf(jnp.concatenate(
            [x, jax.nn.one_hot(labels, num_classes, dtype=jnp.float32)], axis=-1))
        w1, w2 = bf(p["w1"]), bf(p["w2"])
        agg1 = bf(jnp.dot(a, xin, precision=hi))
        h1 = jnp.maximum(jnp.dot(agg1, w1, precision=hi) + p["b1"], 0.0)
        h1 = bf(h1)
        agg2 = bf(jnp.dot(a, h1, precision=hi))
        return jnp.dot(agg2, w2, precision=hi) + p["b2"]

    r = ref_forward(x, edge_index, class_labels, params)
    assert out.shape == (num_nodes, output_dim)
    assert jnp.allclose(out, r, atol=1e-2, rtol=1e-2), (out, r)
    print("KERNEL_OK")
</pallas_src>

<mosaic_0001>
module attributes {stable_mosaic.version = 11 : i64} {
  func.func @_gcn_layer_kernel(%arg0: i32, %arg1: i32, %arg2: memref<128x128xbf16, #tpu.memory_space<vmem>>, %arg3: memref<128x128xbf16, #tpu.memory_space<vmem>>, %arg4: memref<128x128xbf16, #tpu.memory_space<vmem>>, %arg5: memref<1x128xf32, #tpu.memory_space<vmem>>, %arg6: memref<128x128xbf16, #tpu.memory_space<vmem>>, %arg7: memref<128x128xf32, #tpu.memory_space<vmem>>) attributes {dimension_semantics = [#tpu.dimension_semantics<parallel>, #tpu.dimension_semantics<arbitrary>], iteration_bounds = array<i64: 1, 1>, scalar_prefetch = 0 : i64, scratch_operands = 1 : i64, tpu.core_type = #tpu.core_type<tc>, window_params = [{transform_indices = @transform_0, window_bounds = array<i64: 128, 128>}, {transform_indices = @transform_1, window_bounds = array<i64: 128, 128>}, {pipeline_mode = #tpu.pipeline_mode<synchronous>, transform_indices = @transform_2, window_bounds = array<i64: 128, 128>}, {pipeline_mode = #tpu.pipeline_mode<synchronous>, transform_indices = @transform_3, window_bounds = array<i64: 1, 128>}, {transform_indices = @transform_4, window_bounds = array<i64: 128, 128>}]} {
    %c0_i32 = arith.constant 0 : i32
    %0 = arith.cmpi eq, %arg1, %c0_i32 : i32
    %1 = arith.extui %0 : i1 to i32
    %c0_i32_0 = arith.constant 0 : i32
    %2 = arith.cmpi ne, %1, %c0_i32_0 : i32
    scf.if %2 {
      %cst_10 = arith.constant 0.000000e+00 : f32
      %12 = vector.broadcast %cst_10 : f32 to vector<128x128xf32>
      %c0_11 = arith.constant 0 : index
      %c0_12 = arith.constant 0 : index
      %13 = vector.load %arg7[%c0_11, %c0_12] : memref<128x128xf32, #tpu.memory_space<vmem>>, vector<128x128xf32>
      tpu.vector_store %arg7[%c0_11, %c0_12], %12 {strides = array<i32>} : memref<128x128xf32, #tpu.memory_space<vmem>>, vector<128x128xf32>,
    } else {
    }
    %c0 = arith.constant 0 : index
    %c0_1 = arith.constant 0 : index
    %3 = vector.load %arg7[%c0, %c0_1] : memref<128x128xf32, #tpu.memory_space<vmem>>, vector<128x128xf32>
    %c0_2 = arith.constant 0 : index
    %c0_3 = arith.constant 0 : index
    %4 = vector.load %arg2[%c0_2, %c0_3] : memref<128x128xbf16, #tpu.memory_space<vmem>>, vector<128x128xbf16>
    %c0_4 = arith.constant 0 : index
    %c0_5 = arith.constant 0 : index
    %5 = vector.load %arg3[%c0_4, %c0_5] : memref<128x128xbf16, #tpu.memory_space<vmem>>, vector<128x128xbf16>
    %cst = arith.constant dense<0.000000e+00> : vector<128x128xf32>
    %6 = tpu.matmul %4, %5, %cst {dimension_numbers = #tpu.dot_dimension_numbers<[1], [0], [0], [1], [0, 0, 1, 1], [], []>} : vector<128x128xbf16>, vector<128x128xbf16>, vector<128x128xf32> -> vector<128x128xf32>
    %7 = arith.addf %3, %6 : vector<128x128xf32>
    %c0_6 = arith.constant 0 : index
    %c0_7 = arith.constant 0 : index
    %8 = vector.load %arg7[%c0_6, %c0_7] : memref<128x128xf32, #tpu.memory_space<vmem>>, vector<128x128xf32>
    tpu.vector_store %arg7[%c0_6, %c0_7], %7 {strides = array<i32>} : memref<128x128xf32, #tpu.memory_space<vmem>>, vector<128x128xf32>,
    %c0_i32_8 = arith.constant 0 : i32
    %9 = arith.cmpi eq, %arg1, %c0_i32_8 : i32
    %10 = arith.extui %9 : i1 to i32
    %c0_i32_9 = arith.constant 0 : i32
    %11 = arith.cmpi ne, %10, %c0_i32_9 : i32
    scf.if %11 {
      %c0_10 = arith.constant 0 : index
      %c0_11 = arith.constant 0 : index
      %12 = vector.load %arg7[%c0_10, %c0_11] : memref<128x128xf32, #tpu.memory_space<vmem>>, vector<128x128xf32>
      %13 = arith.truncf %12 : vector<128x128xf32> to vector<128x128xbf16>
      %c0_12 = arith.constant 0 : index
      %c0_13 = arith.constant 0 : index
      %14 = vector.load %arg4[%c0_12, %c0_13] : memref<128x128xbf16, #tpu.memory_space<vmem>>, vector<128x128xbf16>
      %cst_14 = arith.constant dense<0.000000e+00> : vector<128x128xf32>
      %15 = tpu.matmul %13, %14, %cst_14 {dimension_numbers = #tpu.dot_dimension_numbers<[1], [0], [0], [1], [0, 0, 1, 1], [], []>} : vector<128x128xbf16>, vector<128x128xbf16>, vector<128x128xf32> -> vector<128x128xf32>
      %c0_15 = arith.constant 0 : index
      %c0_16 = arith.constant 0 : index
      %16 = vector.load %arg5[%c0_15, %c0_16] : memref<1x128xf32, #tpu.memory_space<vmem>>, vector<1x128xf32>
      %17 = vector.broadcast %16 : vector<1x128xf32> to vector<128x128xf32>
      %18 = arith.addf %15, %17 : vector<128x128xf32>
      %cst_17 = arith.constant 0.000000e+00 : f32
      %19 = vector.broadcast %cst_17 : f32 to vector<128x128xf32>
      %20 = arith.maximumf %18, %19 : vector<128x128xf32>
      %21 = arith.truncf %20 : vector<128x128xf32> to vector<128x128xbf16>
      %c0_18 = arith.constant 0 : index
      %c0_19 = arith.constant 0 : index
      %22 = vector.load %arg6[%c0_18, %c0_19] : memref<128x128xbf16, #tpu.memory_space<vmem>>, vector<128x128xbf16>
      tpu.vector_store %arg6[%c0_18, %c0_19], %21 {strides = array<i32>} : memref<128x128xbf16, #tpu.memory_space<vmem>>, vector<128x128xbf16>,
    } else {
    }
    return
  }
  func.func @transform_0(%arg0: i32, %arg1: i32) -> (i32, i32) {
    %c0_i32 = arith.constant 0 : i32
    return %arg0, %arg1 : i32, i32
  }
  func.func @transform_1(%arg0: i32, %arg1: i32) -> (i32, i32) {
    %c0_i32 = arith.constant 0 : i32
    %c0_i32_0 = arith.constant 0 : i32
    return %arg1, %c0_i32 : i32, i32
  }
  func.func @transform_2(%arg0: i32, %arg1: i32) -> (i32, i32) {
    %c0_i32 = arith.constant 0 : i32
    %c0_i32_0 = arith.constant 0 : i32
    %c0_i32_1 = arith.constant 0 : i32
    return %c0_i32, %c0_i32_0 : i32, i32
  }
  func.func @transform_3(%arg0: i32, %arg1: i32) -> (i32, i32) {
    %c0_i32 = arith.constant 0 : i32
    %c0_i32_0 = arith.constant 0 : i32
    %c0_i32_1 = arith.constant 0 : i32
    return %c0_i32, %c0_i32_0 : i32, i32
  }
  func.func @transform_4(%arg0: i32, %arg1: i32) -> (i32, i32) {
    %c0_i32 = arith.constant 0 : i32
    %c0_i32_0 = arith.constant 0 : i32
    return %arg0, %c0_i32 : i32, i32
  }
}

module attributes {stable_mosaic.version = 11 : i64} {
  func.func @_gcn_layer_kernel(%arg0: i32, %arg1: i32, %arg2: memref<128x128xbf16, #tpu.memory_space<vmem>>, %arg3: memref<128x128xbf16, #tpu.memory_space<vmem>>, %arg4: memref<128x128xbf16, #tpu.memory_space<vmem>>, %arg5: memref<1x128xf32, #tpu.memory_space<vmem>>, %arg6: memref<128x128xf32, #tpu.memory_space<vmem>>, %arg7: memref<128x128xf32, #tpu.memory_space<vmem>>) attributes {dimension_semantics = [#tpu.dimension_semantics<parallel>, #tpu.dimension_semantics<arbitrary>], iteration_bounds = array<i64: 1, 1>, scalar_prefetch = 0 : i64, scratch_operands = 1 : i64, tpu.core_type = #tpu.core_type<tc>, window_params = [{transform_indices = @transform_0, window_bounds = array<i64: 128, 128>}, {transform_indices = @transform_1, window_bounds = array<i64: 128, 128>}, {pipeline_mode = #tpu.pipeline_mode<synchronous>, transform_indices = @transform_2, window_bounds = array<i64: 128, 128>}, {pipeline_mode = #tpu.pipeline_mode<synchronous>, transform_indices = @transform_3, window_bounds = array<i64: 1, 128>}, {transform_indices = @transform_4, window_bounds = array<i64: 128, 128>}]} {
    %c0_i32 = arith.constant 0 : i32
    %0 = arith.cmpi eq, %arg1, %c0_i32 : i32
    %1 = arith.extui %0 : i1 to i32
    %c0_i32_0 = arith.constant 0 : i32
    %2 = arith.cmpi ne, %1, %c0_i32_0 : i32
    scf.if %2 {
      %cst_10 = arith.constant 0.000000e+00 : f32
      %12 = vector.broadcast %cst_10 : f32 to vector<128x128xf32>
      %c0_11 = arith.constant 0 : index
      %c0_12 = arith.constant 0 : index
      %13 = vector.load %arg7[%c0_11, %c0_12] : memref<128x128xf32, #tpu.memory_space<vmem>>, vector<128x128xf32>
      tpu.vector_store %arg7[%c0_11, %c0_12], %12 {strides = array<i32>} : memref<128x128xf32, #tpu.memory_space<vmem>>, vector<128x128xf32>,
    } else {
    }
    %c0 = arith.constant 0 : index
    %c0_1 = arith.constant 0 : index
    %3 = vector.load %arg7[%c0, %c0_1] : memref<128x128xf32, #tpu.memory_space<vmem>>, vector<128x128xf32>
    %c0_2 = arith.constant 0 : index
    %c0_3 = arith.constant 0 : index
    %4 = vector.load %arg2[%c0_2, %c0_3] : memref<128x128xbf16, #tpu.memory_space<vmem>>, vector<128x128xbf16>
    %c0_4 = arith.constant 0 : index
    %c0_5 = arith.constant 0 : index
    %5 = vector.load %arg3[%c0_4, %c0_5] : memref<128x128xbf16, #tpu.memory_space<vmem>>, vector<128x128xbf16>
    %cst = arith.constant dense<0.000000e+00> : vector<128x128xf32>
    %6 = tpu.matmul %4, %5, %cst {dimension_numbers = #tpu.dot_dimension_numbers<[1], [0], [0], [1], [0, 0, 1, 1], [], []>} : vector<128x128xbf16>, vector<128x128xbf16>, vector<128x128xf32> -> vector<128x128xf32>
    %7 = arith.addf %3, %6 : vector<128x128xf32>
    %c0_6 = arith.constant 0 : index
    %c0_7 = arith.constant 0 : index
    %8 = vector.load %arg7[%c0_6, %c0_7] : memref<128x128xf32, #tpu.memory_space<vmem>>, vector<128x128xf32>
    tpu.vector_store %arg7[%c0_6, %c0_7], %7 {strides = array<i32>} : memref<128x128xf32, #tpu.memory_space<vmem>>, vector<128x128xf32>,
    %c0_i32_8 = arith.constant 0 : i32
    %9 = arith.cmpi eq, %arg1, %c0_i32_8 : i32
    %10 = arith.extui %9 : i1 to i32
    %c0_i32_9 = arith.constant 0 : i32
    %11 = arith.cmpi ne, %10, %c0_i32_9 : i32
    scf.if %11 {
      %c0_10 = arith.constant 0 : index
      %c0_11 = arith.constant 0 : index
      %12 = vector.load %arg7[%c0_10, %c0_11] : memref<128x128xf32, #tpu.memory_space<vmem>>, vector<128x128xf32>
      %13 = arith.truncf %12 : vector<128x128xf32> to vector<128x128xbf16>
      %c0_12 = arith.constant 0 : index
      %c0_13 = arith.constant 0 : index
      %14 = vector.load %arg4[%c0_12, %c0_13] : memref<128x128xbf16, #tpu.memory_space<vmem>>, vector<128x128xbf16>
      %cst_14 = arith.constant dense<0.000000e+00> : vector<128x128xf32>
      %15 = tpu.matmul %13, %14, %cst_14 {dimension_numbers = #tpu.dot_dimension_numbers<[1], [0], [0], [1], [0, 0, 1, 1], [], []>} : vector<128x128xbf16>, vector<128x128xbf16>, vector<128x128xf32> -> vector<128x128xf32>
      %c0_15 = arith.constant 0 : index
      %c0_16 = arith.constant 0 : index
      %16 = vector.load %arg5[%c0_15, %c0_16] : memref<1x128xf32, #tpu.memory_space<vmem>>, vector<1x128xf32>
      %17 = vector.broadcast %16 : vector<1x128xf32> to vector<128x128xf32>
      %18 = arith.addf %15, %17 : vector<128x128xf32>
      %c0_17 = arith.constant 0 : index
      %c0_18 = arith.constant 0 : index
      %19 = vector.load %arg6[%c0_17, %c0_18] : memref<128x128xf32, #tpu.memory_space<vmem>>, vector<128x128xf32>
      tpu.vector_store %arg6[%c0_17, %c0_18], %18 {strides = array<i32>} : memref<128x128xf32, #tpu.memory_space<vmem>>, vector<128x128xf32>,
    } else {
    }
    return
  }
  func.func @transform_0(%arg0: i32, %arg1: i32) -> (i32, i32) {
    %c0_i32 = arith.constant 0 : i32
    return %arg0, %arg1 : i32, i32
  }
  func.func @transform_1(%arg0: i32, %arg1: i32) -> (i32, i32) {
    %c0_i32 = arith.constant 0 : i32
    %c0_i32_0 = arith.constant 0 : i32
    return %arg1, %c0_i32 : i32, i32
  }
  func.func @transform_2(%arg0: i32, %arg1: i32) -> (i32, i32) {
    %c0_i32 = arith.constant 0 : i32
    %c0_i32_0 = arith.constant 0 : i32
    %c0_i32_1 = arith.constant 0 : i32
    return %c0_i32, %c0_i32_0 : i32, i32
  }
  func.func @transform_3(%arg0: i32, %arg1: i32) -> (i32, i32) {
    %c0_i32 = arith.constant 0 : i32
    %c0_i32_0 = arith.constant 0 : i32
    %c0_i32_1 = arith.constant 0 : i32
    return %c0_i32, %c0_i32_0 : i32, i32
  }
  func.func @transform_4(%arg0: i32, %arg1: i32) -> (i32, i32) {
    %c0_i32 = arith.constant 0 : i32
    %c0_i32_0 = arith.constant 0 : i32
    return %arg0, %c0_i32 : i32, i32
  }
}

</mosaic_0001>

<bundles_post_ra>
// kernel: fwd.3
= control target key start
LH: loop header
LB: loop body
LE: loop exit
PB: predicated region body
PF: predicated region fallthrough
CT: control target
= control target key end

     0   :  { %s819_s1 = inlined_call_operand.vmem [shape: bf16[128,128], index: 1, kind: input, shape index: {}]   ;;  %s820_s0 = inlined_call_operand.vmem [shape: bf16[128,128], index: 0, kind: input, shape index: {}]   ;;  %s821_s2 = inlined_call_operand.vmem [shape: bf16[128,128], index: 2, kind: input, shape index: {}]   ;;  %s822_s3 = inlined_call_operand.vmem [shape: f32[1,128], index: 3, kind: input, shape index: {}]   ;;  %s823_s4 = inlined_call_operand.vmem [shape: f32[128,128], index: 4, kind: output, shape index: {}]  }
   0x1   :  { %v647_v0 = vld [vmem:[%s819_s1 + $0x38] sm:$0xff]   ;;  %v648_v1 = vld [vmem:[%s819_s1 + $0x30] sm:$0xff]   ;;  %v649_v2 = vld [vmem:[%s819_s1 + $0x28] sm:$0xff]  }
   0x2   :  { %583 = vmatprep.subr.bf16.mxu0 %v647_v0  ;;  %v650_v3 = vld [vmem:[%s819_s1 + $0x20] sm:$0xff]   ;;  %v651_v5 = vld [vmem:[%s819_s1 + $0x18] sm:$0xff]   ;;  %v652_v6 = vld [vmem:[%s819_s1 + $0x10] sm:$0xff]  }
   0x3   :  { %584 = vmatpush3.bf16.msra.mxu0 %v647_v0  ;;  %v655_v4 = vld [vmem:[%s820_s0] sm:$0xff]   ;;  %v663_v7 = vld [vmem:[%s821_s2 + $0x38] sm:$0xff]   ;;  %v664_v8 = vld [vmem:[%s821_s2 + $0x30] sm:$0xff]  }
   0x4   :  { %585 = vmatprep.subr.bf16.mxu0 %v648_v1  ;;  %599 = vmatprep.mubr.bf16.mxu0 %v655_v4  ;;  %v653_v9 = vld [vmem:[%s819_s1 + $0x8] sm:$0xff]   ;;  %v654_v11 = vld [vmem:[%s819_s1] sm:$0xff]   ;;  %v667_v13 = vld [vmem:[%s821_s2 + $0x18] sm:$0xff]  }
   0x5   :  { %615 = vmatprep.subr.bf16.mxu1 %v663_v7  ;;  %v665_v10 = vld [vmem:[%s821_s2 + $0x28] sm:$0xff]   ;;  %v666_v12 = vld [vmem:[%s821_s2 + $0x20] sm:$0xff]   ;;  %v657_v15 = vld [vmem:[%s820_s0 + $0x10] sm:$0xff]  }
   0x6   :  { %616 = vmatpush3.bf16.msra.mxu1 %v663_v7  ;;  %v656_v14 = vld [vmem:[%s820_s0 + $0x8] sm:$0xff]   ;;  %v668_v16 = vld [vmem:[%s821_s2 + $0x10] sm:$0xff]   ;;  %v658_v17 = vld [vmem:[%s820_s0 + $0x18] sm:$0xff]  }
   0x7   :  { %586 = vmatpush3.bf16.msra.mxu0 %v648_v1  ;;  %617 = vmatprep.subr.bf16.mxu1 %v664_v8  ;;  %v659_v18 = vld [vmem:[%s820_s0 + $0x20] sm:$0xff]   ;;  %v660_v19 = vld [vmem:[%s820_s0 + $0x28] sm:$0xff]   ;;  %v661_v20 = vld [vmem:[%s820_s0 + $0x30] sm:$0xff]  }
   0x8   :  { %587 = vmatprep.subr.bf16.mxu0 %v649_v2  ;;  %v662_v21 = vld [vmem:[%s820_s0 + $0x38] sm:$0xff]   ;;  %v669_v22 = vld [vmem:[%s821_s2 + $0x8] sm:$0xff]   ;;  %v670_v23 = vld [vmem:[%s821_s2] sm:$0xff]  }
   0x9   :  { %v542_v48 = vld [vmem:[%s822_s3] ss:$0 sm:$0xff] }
   0xa   :  { %618 = vmatpush3.bf16.msra.mxu1 %v664_v8 }
   0xb   :  { %588 = vmatpush3.bf16.msra.mxu0 %v649_v2  ;;  %619 = vmatprep.subr.bf16.mxu1 %v665_v10 }
   0xc   :  { %589 = vmatprep.subr.bf16.mxu0 %v650_v3 }
   0xe   :  { %620 = vmatpush3.bf16.msra.mxu1 %v665_v10 }
   0xf   :  { %590 = vmatpush3.bf16.msra.mxu0 %v650_v3  ;;  %621 = vmatprep.subr.bf16.mxu1 %v666_v12 }
  0x10   :  { %591 = vmatprep.subr.bf16.mxu0 %v651_v5 }
  0x12   :  { %622 = vmatpush3.bf16.msra.mxu1 %v666_v12 }
  0x13   :  { %592 = vmatpush3.bf16.msra.mxu0 %v651_v5  ;;  %623 = vmatprep.subr.bf16.mxu1 %v667_v13 }
  0x14   :  { %593 = vmatprep.subr.bf16.mxu0 %v652_v6 }
  0x16   :  { %624 = vmatpush3.bf16.msra.mxu1 %v667_v13 }
  0x17   :  { %594 = vmatpush3.bf16.msra.mxu0 %v652_v6  ;;  %625 = vmatprep.subr.bf16.mxu1 %v668_v16 }
  0x18   :  { %595 = vmatprep.subr.bf16.mxu0 %v653_v9 }
  0x1a   :  { %626 = vmatpush3.bf16.msra.mxu1 %v668_v16 }
  0x1b   :  { %596 = vmatpush3.bf16.msra.mxu0 %v653_v9  ;;  %627 = vmatprep.subr.bf16.mxu1 %v669_v22 }
  0x1c   :  { %597 = vmatprep.subr.bf16.mxu0 %v654_v11 }
  0x1e   :  { %628 = vmatpush3.bf16.msra.mxu1 %v669_v22 }
  0x1f   :  { %598 = vmatpush3.bf16.msra.mxu0 %v654_v11  ;;  %629 = vmatprep.subr.bf16.mxu1 %v670_v23 }
  0x22   :  { %600 = vmatmul.mubr.bf16.vlgmr.msra.gmra.mxu0 %v656_v14  ;;  %630 = vmatpush3.bf16.msra.mxu1 %v670_v23 }
  0x23   :  { %603 = vmatprep.mubr.bf16.mxu0 %v657_v15 }
  0x2a   :  { %604 = vmatmul.mubr.bf16.gmra.mxu0 %v658_v17 }
  0x2b   :  { %607 = vmatprep.mubr.bf16.mxu0 %v659_v18 }
  0x32   :  { %608 = vmatmul.mubr.bf16.gmra.mxu0 %v660_v19 }
  0x33   :  { %611 = vmatprep.mubr.bf16.mxu0 %v661_v20 }
  0x3a   :  { %612 = vmatmul.mubr.bf16.gmra.mxu0 %v662_v21 }
  0xe2   :  { %v601_v24 = vpop.f32.mrf.mxu0 }
  0xe4   :  { %v216_v25 = vpop.f32.mrf.mxu0 }
  0xe6   :  { %v602_v26 = vpop.f32.mrf.mxu0 }
  0xe7   :  { %v331_v29 = vpack.c.bf16 %v602_v26, %v601_v24 }
  0xe8   :  { %v219_v27 = vpop.f32.mrf.mxu0 }
  0xe9   :  { %v330_v28 = vpack.c.bf16 %v219_v27, %v216_v25 }
  0xea   :  { %v605_v30 = vpop.f32.mrf.mxu0 }
  0xeb   :  { %631 = vmatprep.mubr.bf16.mxu1 %v330_v28 }
  0xec   :  { %v232_v31 = vpop.f32.mrf.mxu0  ;;  %632 = vmatmul.mubr.bf16.vlgmr.msra.gmra.mxu1 %v331_v29 }
  0xee   :  { %v606_v32 = vpop.f32.mrf.mxu0 }
  0xef   :  { %v333_v35 = vpack.c.bf16 %v606_v32, %v605_v30 }
  0xf0   :  { %v235_v33 = vpop.f32.mrf.mxu0 }
  0xf1   :  { %v332_v34 = vpack.c.bf16 %v235_v33, %v232_v31 }
  0xf2   :  { %v609_v36 = vpop.f32.mrf.mxu0 }
  0xf3   :  { %635 = vmatprep.mubr.bf16.mxu1 %v332_v34 }
  0xf4   :  { %v248_v37 = vpop.f32.mrf.mxu0  ;;  %636 = vmatmul.mubr.bf16.gmra.mxu1 %v333_v35 }
  0xf6   :  { %v610_v38 = vpop.f32.mrf.mxu0 }
  0xf7   :  { %v335_v41 = vpack.c.bf16 %v610_v38, %v609_v36 }
  0xf8   :  { %v251_v39 = vpop.f32.mrf.mxu0 }
  0xf9   :  { %v334_v40 = vpack.c.bf16 %v251_v39, %v248_v37 }
  0xfa   :  { %v613_v42 = vpop.f32.mrf.mxu0 }
  0xfb   :  { %639 = vmatprep.mubr.bf16.mxu1 %v334_v40 }
  0xfc   :  { %v264_v43 = vpop.f32.mrf.mxu0  ;;  %640 = vmatmul.mubr.bf16.gmra.mxu1 %v335_v41 }
  0xfe   :  { %v614_v44 = vpop.f32.mrf.mxu0 }
  0xff   :  { %v337_v47 = vpack.c.bf16 %v614_v44, %v613_v42 }
 0x100   :  { %v267_v45 = vpop.f32.mrf.mxu0 }
 0x101   :  { %v336_v46 = vpack.c.bf16 %v267_v45, %v264_v43 }
 0x103   :  { %643 = vmatprep.mubr.bf16.mxu1 %v336_v46 }
 0x104   :  { %644 = vmatmul.mubr.bf16.gmra.mxu1 %v337_v47 }
 0x1ac   :  { %v633_v49 = vpop.f32.mrf.mxu1 }
 0x1ad   :  { %v452_v50 = vadd.f32 %v633_v49, %v542_v48 }
 0x1ae   :  { %v443_v51 = vpop.f32.mrf.mxu1 }
 0x1af   :  { %508 = vst [vmem:[%s823_s4 + $0x10] sm:$0xff] %v452_v50  ;;  %v444_v52 = vadd.f32 %v542_v48, %v443_v51 }
 0x1b0   :  { %v634_v53 = vpop.f32.mrf.mxu1 }
 0x1b1   :  { %506 = vst [vmem:[%s823_s4] sm:$0xff] %v444_v52  ;;  %v455_v54 = vadd.f32 %v634_v53, %v542_v48 }
 0x1b2   :  { %v446_v55 = vpop.f32.mrf.mxu1 }
 0x1b3   :  { %509 = vst [vmem:[%s823_s4 + $0x18] sm:$0xff] %v455_v54  ;;  %v447_v56 = vadd.f32 %v542_v48, %v446_v55 }
 0x1b4   :  { %v637_v57 = vpop.f32.mrf.mxu1 }
 0x1b5   :  { %507 = vst [vmem:[%s823_s4 + $0x8] sm:$0xff] %v447_v56  ;;  %v468_v58 = vadd.f32 %v637_v57, %v542_v48 }
 0x1b6   :  { %v459_v59 = vpop.f32.mrf.mxu1 }
 0x1b7   :  { %512 = vst [vmem:[%s823_s4 + $0x30] sm:$0xff] %v468_v58  ;;  %v460_v60 = vadd.f32 %v542_v48, %v459_v59 }
 0x1b8   :  { %v638_v61 = vpop.f32.mrf.mxu1 }
 0x1b9   :  { %510 = vst [vmem:[%s823_s4 + $0x20] sm:$0xff] %v460_v60  ;;  %v471_v62 = vadd.f32 %v638_v61, %v542_v48 }
 0x1ba   :  { %v462_v63 = vpop.f32.mrf.mxu1 }
 0x1bb   :  { %513 = vst [vmem:[%s823_s4 + $0x38] sm:$0xff] %v471_v62  ;;  %v463_v0 = vadd.f32 %v542_v48, %v462_v63 }
 0x1bc   :  { %v641_v1 = vpop.f32.mrf.mxu1 }
 0x1bd   :  { %511 = vst [vmem:[%s823_s4 + $0x28] sm:$0xff] %v463_v0  ;;  %v484_v2 = vadd.f32 %v641_v1, %v542_v48 }
 0x1be   :  { %v475_v3 = vpop.f32.mrf.mxu1 }
 0x1bf   :  { %516 = vst [vmem:[%s823_s4 + $0x50] sm:$0xff] %v484_v2  ;;  %v476_v4 = vadd.f32 %v542_v48, %v475_v3 }
 0x1c0   :  { %v642_v5 = vpop.f32.mrf.mxu1 }
 0x1c1   :  { %514 = vst [vmem:[%s823_s4 + $0x40] sm:$0xff] %v476_v4  ;;  %v487_v6 = vadd.f32 %v642_v5, %v542_v48 }
 0x1c2   :  { %v478_v7 = vpop.f32.mrf.mxu1 }
 0x1c3   :  { %517 = vst [vmem:[%s823_s4 + $0x58] sm:$0xff] %v487_v6  ;;  %v479_v8 = vadd.f32 %v542_v48, %v478_v7 }
 0x1c4   :  { %v645_v9 = vpop.f32.mrf.mxu1 }
 0x1c5   :  { %515 = vst [vmem:[%s823_s4 + $0x48] sm:$0xff] %v479_v8  ;;  %v500_v10 = vadd.f32 %v645_v9, %v542_v48 }
 0x1c6   :  { %v491_v11 = vpop.f32.mrf.mxu1 }
 0x1c7   :  { %520 = vst [vmem:[%s823_s4 + $0x70] sm:$0xff] %v500_v10  ;;  %v492_v12 = vadd.f32 %v542_v48, %v491_v11 }
 0x1c8   :  { %v646_v13 = vpop.f32.mrf.mxu1 }
 0x1c9   :  { %518 = vst [vmem:[%s823_s4 + $0x60] sm:$0xff] %v492_v12  ;;  %v503_v14 = vadd.f32 %v646_v13, %v542_v48 }
 0x1ca   :  { %v494_v15 = vpop.f32.mrf.mxu1 }
 0x1cb   :  { %521 = vst [vmem:[%s823_s4 + $0x78] sm:$0xff] %v503_v14  ;;  %v495_v16 = vadd.f32 %v542_v48, %v494_v15 }
 0x1cd   :  { %519 = vst [vmem:[%s823_s4 + $0x68] sm:$0xff] %v495_v16 }

// kernel: fwd.2
= control target key start
LH: loop header
LB: loop body
LE: loop exit
PB: predicated region body
PF: predicated region fallthrough
CT: control target
= control target key end

     0   :  { %9 = vsyncpa [#allocation4], 0  ;;  %s870_s15 = smov [#allocation3]   ;;  %s976_s0 = inlined_call_operand.vmem [shape: bf16[128,128], index: 0, kind: input, shape index: {}]   ;;  %s977_s1 = inlined_call_operand.vmem [shape: bf16[128,128], index: 1, kind: input, shape index: {}]   ;;  %s978_s2 = inlined_call_operand.hbm [shape: bf16[128,128], index: 2, kind: input, shape index: {}]   ;;  %s979_s3 = inlined_call_operand.vmem [shape: f32[1,128], index: 3, kind: input, shape index: {}]   ;;  %s980_s4 = inlined_call_operand.vmem [shape: bf16[128,128], index: 4, kind: output, shape index: {}]  }
   0x1   :  { %s19_s16 = sshll.u32 %s870_s15, 4  ;;  %s20_s16 = int_to_ptr.vmem [resolvable:$true] %s19_s16 }
   0x2   :  { %s856_s17 = scalar_lea.vmem %s20_s16, 1024  ;;  %p861_p1 = scmp.lt.s32.totalorder %s20_s16, %s20_s16 }
   0x3   :  { %p857_p0 = scmp.ne.s32.totalorder %s20_s16, %s856_s17  ;;  %p862_p2 = scmp.lt.s32.totalorder %s856_s17, %s856_s17 }
   0x5   :  { %p863_p3 = por %p862_p2, %p861_p1 }
   0x7   :  { %p864_p4 = pnand %p863_p3, %p857_p0 }
   0x9   :  { %867 = shalt.err (!%p864_p4)
}
   0xa   :  { %s871_s18 = smov 64   ;;  %s872_s19 = smov 4  }
   0xb   :  { %25 = dma.hbm_to_vmem [thread:$0]  %s978_s2, 1024, %s20_s16, [#allocation4], %s871_s18, %s871_s18, %s872_s19  }
   0xc   :  { %868 = dma.done.wait [#allocation4], 1024  }
   0xd   :  { %869 = vsyncadd [#allocation4], 4294966272  ;;  %v824_v0 = vld [vmem:[%s977_s1 + $0x38] sm:$0xff]   ;;  %v825_v1 = vld [vmem:[%s977_s1 + $0x30] sm:$0xff]  }
   0xe   :  { %757 = vmatprep.subr.bf16.mxu0 %v824_v0  ;;  %v826_v2 = vld [vmem:[%s977_s1 + $0x28] sm:$0xff]   ;;  %v827_v3 = vld [vmem:[%s977_s1 + $0x20] sm:$0xff]   ;;  %v828_v5 = vld [vmem:[%s977_s1 + $0x18] sm:$0xff]  }
   0xf   :  { %758 = vmatpush3.bf16.msra.mxu0 %v824_v0  ;;  %v832_v4 = vld [vmem:[%s976_s0] sm:$0xff]   ;;  %v829_v6 = vld [vmem:[%s977_s1 + $0x10] sm:$0xff]   ;;  %v840_v7 = vld [vmem:[#allocation3 + $0x38] sm:$0xff]  }
  0x10   :  { %759 = vmatprep.subr.bf16.mxu0 %v825_v1  ;;  %773 = vmatprep.mubr.bf16.mxu0 %v832_v4  ;;  %v841_v8 = vld [vmem:[#allocation3 + $0x30] sm:$0xff]   ;;  %v830_v9 = vld [vmem:[%s977_s1 + $0x8] sm:$0xff]   ;;  %v831_v11 = vld [vmem:[%s977_s1] sm:$0xff]  }
  0x11   :  { %789 = vmatprep.subr.bf16.mxu1 %v840_v7  ;;  %v842_v10 = vld [vmem:[#allocation3 + $0x28] sm:$0xff]   ;;  %v843_v12 = vld [vmem:[#allocation3 + $0x20] sm:$0xff]   ;;  %v844_v13 = vld [vmem:[#allocation3 + $0x18] sm:$0xff]  }
  0x12   :  { %790 = vmatpush3.bf16.msra.mxu1 %v840_v7  ;;  %v833_v14 = vld [vmem:[%s976_s0 + $0x8] sm:$0xff]   ;;  %v834_v15 = vld [vmem:[%s976_s0 + $0x10] sm:$0xff]   ;;  %v835_v17 = vld [vmem:[%s976_s0 + $0x18] sm:$0xff]  }
  0x13   :  { %760 = vmatpush3.bf16.msra.mxu0 %v825_v1  ;;  %791 = vmatprep.subr.bf16.mxu1 %v841_v8  ;;  %v845_v16 = vld [vmem:[#allocation3 + $0x10] sm:$0xff]   ;;  %v836_v18 = vld [vmem:[%s976_s0 + $0x20] sm:$0xff]   ;;  %v837_v19 = vld [vmem:[%s976_s0 + $0x28] sm:$0xff]  }
  0x14   :  { %761 = vmatprep.subr.bf16.mxu0 %v826_v2  ;;  %v838_v20 = vld [vmem:[%s976_s0 + $0x30] sm:$0xff]   ;;  %v839_v21 = vld [vmem:[%s976_s0 + $0x38] sm:$0xff]   ;;  %v846_v22 = vld [vmem:[#allocation3 + $0x8] sm:$0xff]  }
  0x15   :  { %v847_v23 = vld [vmem:[#allocation3] sm:$0xff]  }
  0x16   :  { %792 = vmatpush3.bf16.msra.mxu1 %v841_v8  ;;  %v637_v49 = vld [vmem:[%s979_s3] ss:$0 sm:$0xff] }
  0x17   :  { %762 = vmatpush3.bf16.msra.mxu0 %v826_v2  ;;  %793 = vmatprep.subr.bf16.mxu1 %v842_v10 }
  0x18   :  { %763 = vmatprep.subr.bf16.mxu0 %v827_v3 }
  0x1a   :  { %794 = vmatpush3.bf16.msra.mxu1 %v842_v10 }
  0x1b   :  { %764 = vmatpush3.bf16.msra.mxu0 %v827_v3  ;;  %795 = vmatprep.subr.bf16.mxu1 %v843_v12 }
  0x1c   :  { %765 = vmatprep.subr.bf16.mxu0 %v828_v5 }
  0x1e   :  { %796 = vmatpush3.bf16.msra.mxu1 %v843_v12 }
  0x1f   :  { %766 = vmatpush3.bf16.msra.mxu0 %v828_v5  ;;  %797 = vmatprep.subr.bf16.mxu1 %v844_v13 }
  0x20   :  { %767 = vmatprep.subr.bf16.mxu0 %v829_v6 }
  0x22   :  { %798 = vmatpush3.bf16.msra.mxu1 %v844_v13 }
  0x23   :  { %768 = vmatpush3.bf16.msra.mxu0 %v829_v6  ;;  %799 = vmatprep.subr.bf16.mxu1 %v845_v16 }
  0x24   :  { %769 = vmatprep.subr.bf16.mxu0 %v830_v9 }
  0x26   :  { %800 = vmatpush3.bf16.msra.mxu1 %v845_v16 }
  0x27   :  { %770 = vmatpush3.bf16.msra.mxu0 %v830_v9  ;;  %801 = vmatprep.subr.bf16.mxu1 %v846_v22 }
  0x28   :  { %771 = vmatprep.subr.bf16.mxu0 %v831_v11 }
  0x2a   :  { %802 = vmatpush3.bf16.msra.mxu1 %v846_v22 }
  0x2b   :  { %772 = vmatpush3.bf16.msra.mxu0 %v831_v11  ;;  %803 = vmatprep.subr.bf16.mxu1 %v847_v23 }
  0x2e   :  { %774 = vmatmul.mubr.bf16.vlgmr.msra.gmra.mxu0 %v833_v14  ;;  %804 = vmatpush3.bf16.msra.mxu1 %v847_v23 }
  0x2f   :  { %777 = vmatprep.mubr.bf16.mxu0 %v834_v15 }
  0x36   :  { %778 = vmatmul.mubr.bf16.gmra.mxu0 %v835_v17 }
  0x37   :  { %781 = vmatprep.mubr.bf16.mxu0 %v836_v18 }
  0x3e   :  { %782 = vmatmul.mubr.bf16.gmra.mxu0 %v837_v19 }
  0x3f   :  { %785 = vmatprep.mubr.bf16.mxu0 %v838_v20 }
  0x46   :  { %786 = vmatmul.mubr.bf16.gmra.mxu0 %v839_v21 }
  0xee   :  { %v775_v24 = vpop.f32.mrf.mxu0 }
  0xf0   :  { %v230_v25 = vpop.f32.mrf.mxu0 }
  0xf2   :  { %v776_v26 = vpop.f32.mrf.mxu0 }
  0xf3   :  { %v345_v29 = vpack.c.bf16 %v776_v26, %v775_v24 }
  0xf4   :  { %v233_v27 = vpop.f32.mrf.mxu0 }
  0xf5   :  { %v344_v28 = vpack.c.bf16 %v233_v27, %v230_v25 }
  0xf6   :  { %v779_v30 = vpop.f32.mrf.mxu0 }
  0xf7   :  { %805 = vmatprep.mubr.bf16.mxu1 %v344_v28 }
  0xf8   :  { %v246_v31 = vpop.f32.mrf.mxu0  ;;  %806 = vmatmul.mubr.bf16.vlgmr.msra.gmra.mxu1 %v345_v29 }
  0xfa   :  { %v780_v32 = vpop.f32.mrf.mxu0 }
  0xfb   :  { %v347_v35 = vpack.c.bf16 %v780_v32, %v779_v30 }
  0xfc   :  { %v249_v33 = vpop.f32.mrf.mxu0 }
  0xfd   :  { %v346_v34 = vpack.c.bf16 %v249_v33, %v246_v31 }
  0xfe   :  { %v783_v36 = vpop.f32.mrf.mxu0 }
  0xff   :  { %809 = vmatprep.mubr.bf16.mxu1 %v346_v34 }
 0x100   :  { %v262_v37 = vpop.f32.mrf.mxu0  ;;  %810 = vmatmul.mubr.bf16.gmra.mxu1 %v347_v35 }
 0x102   :  { %v784_v38 = vpop.f32.mrf.mxu0 }
 0x103   :  { %v349_v41 = vpack.c.bf16 %v784_v38, %v783_v36 }
 0x104   :  { %v265_v39 = vpop.f32.mrf.mxu0 }
 0x105   :  { %v348_v40 = vpack.c.bf16 %v265_v39, %v262_v37 }
 0x106   :  { %v787_v42 = vpop.f32.mrf.mxu0 }
 0x107   :  { %813 = vmatprep.mubr.bf16.mxu1 %v348_v40 }
 0x108   :  { %v278_v43 = vpop.f32.mrf.mxu0  ;;  %814 = vmatmul.mubr.bf16.gmra.mxu1 %v349_v41 }
 0x10a   :  { %v788_v44 = vpop.f32.mrf.mxu0 }
 0x10b   :  { %v351_v47 = vpack.c.bf16 %v788_v44, %v787_v42 }
 0x10c   :  { %v281_v45 = vpop.f32.mrf.mxu0 }
 0x10d   :  { %v350_v46 = vpack.c.bf16 %v281_v45, %v278_v43 }
 0x10f   :  { %817 = vmatprep.mubr.bf16.mxu1 %v350_v46 }
 0x110   :  { %818 = vmatmul.mubr.bf16.gmra.mxu1 %v351_v47 }
 0x1b8   :  { %v807_v48 = vpop.f32.mrf.mxu1 }
 0x1b9   :  { %v466_v51 = vadd.f32 %v807_v48, %v637_v49 }
 0x1ba   :  { %v457_v50 = vpop.f32.mrf.mxu1 }
 0x1bb   :  { %v458_v53 = vadd.f32 %v637_v49, %v457_v50  ;;  %v522_v56 = vmax.f32 %v466_v51, 0.0 }
 0x1bc   :  { %v808_v52 = vpop.f32.mrf.mxu1 }
 0x1bd   :  { %v469_v54 = vadd.f32 %v808_v52, %v637_v49  ;;  %v520_v60 = vmax.f32 %v458_v53, 0.0 }
 0x1be   :  { %v460_v55 = vpop.f32.mrf.mxu1 }
 0x1bf   :  { %v523_v57 = vmax.f32 %v469_v54, 0.0  ;;  %v461_v58 = vadd.f32 %v637_v49, %v460_v55 }
 0x1c0   :  { %v811_v59 = vpop.f32.mrf.mxu1 }
 0x1c1   :  { %v686_v61 = vpack.c.bf16 %v523_v57, %v522_v56  ;;  %v521_v62 = vmax.f32 %v461_v58, 0.0  ;;  %v482_v1 = vadd.f32 %v811_v59, %v637_v49 }
 0x1c2   :  { %v473_v63 = vpop.f32.mrf.mxu1 }
 0x1c3   :  { %718 = vst [vmem:[%s980_s4 + $0x8] sm:$0xff] %v686_v61   ;;  %v681_v0 = vpack.c.bf16 %v521_v62, %v520_v60  ;;  %v474_v3 = vadd.f32 %v637_v49, %v473_v63  ;;  %v526_v6 = vmax.f32 %v482_v1, 0.0 }
 0x1c4   :  { %v812_v2 = vpop.f32.mrf.mxu1 }
 0x1c5   :  { %682 = vst [vmem:[%s980_s4] sm:$0xff] %v681_v0   ;;  %v485_v4 = vadd.f32 %v812_v2, %v637_v49  ;;  %v524_v10 = vmax.f32 %v474_v3, 0.0 }
 0x1c6   :  { %v476_v5 = vpop.f32.mrf.mxu1 }
 0x1c7   :  { %v527_v7 = vmax.f32 %v485_v4, 0.0  ;;  %v477_v8 = vadd.f32 %v637_v49, %v476_v5 }
 0x1c8   :  { %v815_v9 = vpop.f32.mrf.mxu1 }
 0x1c9   :  { %v696_v11 = vpack.c.bf16 %v527_v7, %v526_v6  ;;  %v525_v12 = vmax.f32 %v477_v8, 0.0  ;;  %v498_v15 = vadd.f32 %v815_v9, %v637_v49 }
 0x1ca   :  { %v489_v13 = vpop.f32.mrf.mxu1 }
 0x1cb   :  { %720 = vst [vmem:[%s980_s4 + $0x18] sm:$0xff] %v696_v11   ;;  %v691_v14 = vpack.c.bf16 %v525_v12, %v524_v10  ;;  %v490_v17 = vadd.f32 %v637_v49, %v489_v13  ;;  %v530_v20 = vmax.f32 %v498_v15, 0.0 }
 0x1cc   :  { %v816_v16 = vpop.f32.mrf.mxu1 }
 0x1cd   :  { %719 = vst [vmem:[%s980_s4 + $0x10] sm:$0xff] %v691_v14   ;;  %v501_v18 = vadd.f32 %v816_v16, %v637_v49  ;;  %v528_v24 = vmax.f32 %v490_v17, 0.0 }
 0x1ce   :  { %v492_v19 = vpop.f32.mrf.mxu1 }
 0x1cf   :  { %v531_v21 = vmax.f32 %v501_v18, 0.0  ;;  %v493_v22 = vadd.f32 %v637_v49, %v492_v19 }
 0x1d0   :  { %v819_v23 = vpop.f32.mrf.mxu1 }
 0x1d1   :  { %v706_v25 = vpack.c.bf16 %v531_v21, %v530_v20  ;;  %v529_v26 = vmax.f32 %v493_v22, 0.0  ;;  %v514_v29 = vadd.f32 %v819_v23, %v637_v49 }
 0x1d2   :  { %v505_v27 = vpop.f32.mrf.mxu1 }
 0x1d3   :  { %722 = vst [vmem:[%s980_s4 + $0x28] sm:$0xff] %v706_v25   ;;  %v701_v28 = vpack.c.bf16 %v529_v26, %v528_v24  ;;  %v506_v31 = vadd.f32 %v637_v49, %v505_v27  ;;  %v534_v34 = vmax.f32 %v514_v29, 0.0 }
 0x1d4   :  { %v820_v30 = vpop.f32.mrf.mxu1 }
 0x1d5   :  { %721 = vst [vmem:[%s980_s4 + $0x20] sm:$0xff] %v701_v28   ;;  %v517_v32 = vadd.f32 %v820_v30, %v637_v49  ;;  %v532_v37 = vmax.f32 %v506_v31, 0.0 }
 0x1d6   :  { %v508_v33 = vpop.f32.mrf.mxu1 }
 0x1d7   :  { %v535_v35 = vmax.f32 %v517_v32, 0.0  ;;  %v509_v36 = vadd.f32 %v637_v49, %v508_v33 }
 0x1d9   :  { %v716_v38 = vpack.c.bf16 %v535_v35, %v534_v34  ;;  %v533_v39 = vmax.f32 %v509_v36, 0.0 }
 0x1db   :  { %724 = vst [vmem:[%s980_s4 + $0x38] sm:$0xff] %v716_v38   ;;  %v711_v40 = vpack.c.bf16 %v533_v39, %v532_v37 }
 0x1dd   :  { %723 = vst [vmem:[%s980_s4 + $0x30] sm:$0xff] %v711_v40  }
 0x1de   :  { %620 = vsyncpa [#allocation4], 1 }

</bundles_post_ra>
